<compile_context>
chip_gen: v7x
topology: tpu7x:2x2x1
jax: 0.10.0
libtpu: 0.0.40
codegen_flags: <defaults>
</compile_context>

<pallas_src>
import functools

import jax
import jax.numpy as jnp
import numpy as np
from jax.experimental import pallas as pl
from jax.experimental.pallas import tpu as pltpu

_CP = 8  # channel sublanes per frame (one f32 sublane tile)


def _geometry(N, C, H, W, lane_groups_max=8):
    """Static packing geometry for the frame layout."""
    assert C <= _CP, "sublane packing supports at most 8 channels"
    Hp, Wp = H + 2, W + 2
    P = Hp * Wp
    L = 128 * pl.cdiv(P, 128)             # lane-dense slot length per group
    S = 2 if 2 * C <= _CP else 1          # images packed into the 8 sublanes
    G = pl.cdiv(N, S)                     # image groups (frames)
    # Lane packing: NBL groups per grid step amortizes the ~0.35us per-step
    # overhead; keep >= 2 grid steps when possible so both TensorCores get
    # work on v7x (dimension_semantics=("parallel",)).
    NBL = 1 if G <= 1 else min(lane_groups_max, pl.cdiv(G, 2))
    grid = pl.cdiv(G, NBL)
    Gp = grid * NBL
    return dict(C=C, H=H, W=W, Hp=Hp, Wp=Wp, P=P, L=L, S=S,
                NBL=NBL, grid=grid, Gp=Gp)


def nchw_to_frames(x, g, dtype):
    """(N,C,H,W) -> (Gp, 8, L) frames.  Keep activations in this layout across
    chained BasicBlocks; convert once per ResNet stage."""
    N, C, H, W = x.shape
    S, Gp, P, L = g["S"], g["Gp"], g["P"], g["L"]
    xp = jnp.pad(x, ((0, Gp * S - N), (0, 0), (1, 1), (1, 1)))   # batch + spatial pad
    xf = xp.reshape(Gp, S * C, P)                                # pack S images/sublane
    xf = jnp.pad(xf, ((0, 0), (0, _CP - S * C), (0, L - P)))     # sublane/lane pad
    return xf.astype(dtype)


def frames_to_nchw(frames, g, N):
    C, H, W, Hp, Wp, P, S, Gp = (g["C"], g["H"], g["W"], g["Hp"], g["Wp"],
                                 g["P"], g["S"], g["Gp"])
    out = frames[:, :S * C, :P].reshape(Gp * S, C, Hp, Wp)
    return out[:N, :, 1:1 + H, 1:1 + W]


def _interior_mask(g):
    """1 at real output pixels, 0 on the pad ring / lane tail; pre-broadcast to
    all 8 sublanes so the in-kernel multiply is a plain lane-dense VPU op.  It
    doubles as the bias 'tap' block of the im2col."""
    H, W, P, L = g["H"], g["W"], g["P"], g["L"]
    m = jnp.pad(jnp.ones((H, W), jnp.float32), ((1, 1), (1, 1))).reshape(1, P)
    m = jnp.pad(m, ((0, 0), (0, L - P)))
    return jnp.broadcast_to(m, (_CP, L))


def _weight_mat(wf, bias, g, dtype):
    """(C,C,3,3) + (C,) -> (8, 80).  Column k*8+ci multiplies tap k / input
    sublane ci; block-diagonal over the S packed images.  The trailing 8
    columns hold the bias against the mask tap (K padded 72 -> 80)."""
    C, S = g["C"], g["S"]
    w9 = jnp.asarray(wf, jnp.float32).transpose(0, 2, 3, 1).reshape(C, 9, C)
    wm = jnp.zeros((_CP, 9, _CP), jnp.float32)
    bc = jnp.zeros((_CP, _CP), jnp.float32)
    for s in range(S):
        o = s * C
        wm = wm.at[o:o + C, :, o:o + C].set(w9)
        bc = bc.at[o:o + C, 0].set(bias)
    return jnp.concatenate([wm.reshape(_CP, 9 * _CP), bc], axis=1).astype(dtype)


def _make_kernel(Wp, L, NBL, dot_dtype):
    # lane offset of tap (dy, dx) relative to the output pixel, k = dy*3 + dx
    offs = [(dy - 1) * Wp + (dx - 1) for dy in range(3) for dx in range(3)]

    def kernel(mask_ref, xf_ref, w1_ref, w2_ref, out_ref):
        m = mask_ref[...]                                 # (8, L) f32
        w1 = w1_ref[...]                                  # (8, 80) dot_dtype
        w2 = w2_ref[...]

        def taps(a):
            # (8, L) frame -> (80, L) im2col: 9 static lane rolls (XLU slot,
            # cheap; every concat piece is 8 sublanes so pieces stay
            # (8,128)-tile aligned) plus the mask block as the bias 'tap'.
            rolls = [a if off == 0 else pltpu.roll(a, shift=(-off) % L, axis=1)
                     for off in offs]
            return jnp.concatenate(rolls + [m], axis=0).astype(dot_dtype)

        # NBL lane slots (image groups) per grid step: fewer, bigger DMAs and
        # the fixed per-step cost is amortized.  Each slot rolls within its
        # own L lanes (interior taps never reach the slot edges), so nothing
        # wraps across slots and the im2col stays at ~30 vregs per dot.
        for s in range(NBL):
            xf = xf_ref[s].astype(jnp.float32)            # (8, L)

            # conv1 (3x3, pad 1) + folded BN1 (+ bias via mask tap): one dot.
            h1 = jnp.dot(w1, taps(xf), preferred_element_type=jnp.float32)
            # ReLU, then zero the pad ring / lane tail so conv2's rolled taps
            # see correct zero padding (this multiply is load-bearing).
            h1 = jnp.maximum(h1, 0.0) * m

            # conv2 (3x3, pad 1) + folded BN2 (+ bias): one dot.
            out2 = jnp.dot(w2, taps(h1), preferred_element_type=jnp.float32)

            # residual (downsample=None): the input frame already holds x.
            out_ref[s] = out2 + xf

    return kernel


def basic_block_frames(frames, mask, w1m, w2m, g, compute_dtype):
    """Frame-layout BasicBlock: (Gp, 8, L) in -> (Gp, 8, L) f32 out."""
    Gp, NBL, grid, L = g["Gp"], g["NBL"], g["grid"], g["L"]
    K = 10 * _CP
    kernel = _make_kernel(g["Wp"], L, NBL, compute_dtype)
    return pl.pallas_call(
        kernel,
        out_shape=jax.ShapeDtypeStruct((Gp, _CP, L), jnp.float32),
        grid_spec=pltpu.PrefetchScalarGridSpec(
            num_scalar_prefetch=0,
            grid=(grid,),
            in_specs=[
                pl.BlockSpec((_CP, L), lambda i: (0, 0)),           # mask / bias tap
                pl.BlockSpec((NBL, _CP, L), lambda i: (i, 0, 0)),   # input frames
                pl.BlockSpec((_CP, K), lambda i: (0, 0)),           # w1 (+BN1, b1)
                pl.BlockSpec((_CP, K), lambda i: (0, 0)),           # w2 (+BN2, b2)
            ],
            out_specs=pl.BlockSpec((NBL, _CP, L), lambda i: (i, 0, 0)),
        ),
        compiler_params=pltpu.CompilerParams(
            dimension_semantics=("parallel",)),
    )(mask, frames, w1m, w2m)


@functools.partial(jax.jit, static_argnames=("compute_dtype", "lane_groups_max"))
def basic_block_pallas(x, w1f, b1, w2f, b2, *, compute_dtype=jnp.float32,
                       lane_groups_max=8):
    """BasicBlock forward: relu(bn1(conv1(x))) -> bn2(conv2(.)) -> + x.

    w*f / b*: conv weights & biases with eval-mode BatchNorm folded in.
    compute_dtype=jnp.bfloat16 halves HBM frame traffic and MXU input width
    (recommended on v6e/v7x); elementwise math and accumulation stay f32, so
    it is also safe on v5e (no bf16 vector arithmetic).
    """
    N, C, H, W = x.shape
    assert w1f.shape == (C, C, 3, 3) and w2f.shape == (C, C, 3, 3), \
        "downsample=None requires Cin == Cout (3x3 kernels)"
    g = _geometry(N, C, H, W, lane_groups_max)
    frames = nchw_to_frames(x, g, compute_dtype)
    mask = _interior_mask(g)
    w1m = _weight_mat(w1f, b1, g, compute_dtype)
    w2m = _weight_mat(w2f, b2, g, compute_dtype)
    out_frames = basic_block_frames(frames, mask, w1m, w2m, g, compute_dtype)
    return frames_to_nchw(out_frames, g, N)


def fold_bn(w_oihw, gamma, beta, mean, var, eps=1e-5):
    """Fold eval-mode BatchNorm2d into the conv weight/bias (exact rewrite)."""
    scale = gamma / jnp.sqrt(var + eps)
    w = (w_oihw * scale[:, None, None, None]).astype(jnp.float32)
    b = (beta - mean * scale).astype(jnp.float32)
    return w, b


def reference_forward(x, w1, bn1, w2, bn2, eps=1e-5):
    def convbn(y, w, gamma, beta, mean, var):
        y = jax.lax.conv_general_dilated(
            y, w, window_strides=(1, 1), padding=((1, 1), (1, 1)),
            dimension_numbers=("NCHW", "OIHW", "NCHW"),
            precision=jax.lax.Precision.HIGHEST)
        scale = gamma / jnp.sqrt(var + eps)
        shift = beta - mean * scale
        return y * scale[None, :, None, None] + shift[None, :, None, None]

    out = jax.nn.relu(convbn(x, w1, *bn1))
    out = convbn(out, w2, *bn2)
    return out + x                                        # downsample=None


if __name__ == "__main__":
    # BasicBlock(inplanes=4, planes=4, stride=1, downsample=None, pad=1, dilation=1)
    def run_case(key, N, compute_dtype, rtol, atol):
        C, H, W = 4, 16, 16
        ks = jax.random.split(key, 11)
        x = jax.random.normal(ks[0], (N, C, H, W), jnp.float32)
        w1 = 0.1 * jax.random.normal(ks[1], (C, C, 3, 3), jnp.float32)
        w2 = 0.1 * jax.random.normal(ks[2], (C, C, 3, 3), jnp.float32)
        bn1 = (1.0 + 0.1 * jax.random.normal(ks[3], (C,), jnp.float32),
               0.1 * jax.random.normal(ks[4], (C,), jnp.float32),
               0.1 * jax.random.normal(ks[5], (C,), jnp.float32),
               1.0 + 0.1 * jax.random.uniform(ks[6], (C,), jnp.float32))
        bn2 = (1.0 + 0.1 * jax.random.normal(ks[7], (C,), jnp.float32),
               0.1 * jax.random.normal(ks[8], (C,), jnp.float32),
               0.1 * jax.random.normal(ks[9], (C,), jnp.float32),
               1.0 + 0.1 * jax.random.uniform(ks[10], (C,), jnp.float32))
        w1f, b1 = fold_bn(w1, *bn1)
        w2f, b2 = fold_bn(w2, *bn2)

        out = jax.block_until_ready(
            basic_block_pallas(x, w1f, b1, w2f, b2, compute_dtype=compute_dtype))
        ref = jax.block_until_ready(reference_forward(x, w1, bn1, w2, bn2))
        np.testing.assert_allclose(np.asarray(out), np.asarray(ref),
                                   rtol=rtol, atol=atol)

    k1, k2, k3 = jax.random.split(jax.random.PRNGKey(0), 3)

    # Primary config (N=2, C=4, 16x16), f32: exact vs. f32 reference.
    run_case(k1, N=2, compute_dtype=jnp.float32, rtol=1e-3, atol=1e-3)
    # Odd batch: exercises sublane pair packing + lane packing + 2-step grid.
    run_case(k2, N=5, compute_dtype=jnp.float32, rtol=1e-3, atol=1e-3)
    # bf16 frames/weights into the MXU (v6e/v7x recommendation), f32 accumulate.
    run_case(k3, N=2, compute_dtype=jnp.bfloat16, rtol=5e-2, atol=5e-2)

    print("KERNEL_OK")
</pallas_src>

<mosaic_0001>
module attributes {stable_mosaic.version = 11 : i64} {
  func.func @kernel(%arg0: i32, %arg1: memref<8x384xf32, #tpu.memory_space<vmem>>, %arg2: memref<1x8x384xf32, #tpu.memory_space<vmem>>, %arg3: memref<8x80xf32, #tpu.memory_space<vmem>>, %arg4: memref<8x80xf32, #tpu.memory_space<vmem>>, %arg5: memref<1x8x384xf32, #tpu.memory_space<vmem>>) attributes {dimension_semantics = [#tpu.dimension_semantics<parallel>], iteration_bounds = array<i64: 1>, scalar_prefetch = 0 : i64, scratch_operands = 0 : i64, tpu.core_type = #tpu.core_type<tc>, window_params = [{pipeline_mode = #tpu.pipeline_mode<synchronous>, transform_indices = @transform_0, window_bounds = array<i64: 8, 384>}, {transform_indices = @transform_1, window_bounds = array<i64: 1, 8, 384>}, {pipeline_mode = #tpu.pipeline_mode<synchronous>, transform_indices = @transform_2, window_bounds = array<i64: 8, 80>}, {pipeline_mode = #tpu.pipeline_mode<synchronous>, transform_indices = @transform_3, window_bounds = array<i64: 8, 80>}, {transform_indices = @transform_4, window_bounds = array<i64: 1, 8, 384>}]} {
    %c0 = arith.constant 0 : index
    %c0_0 = arith.constant 0 : index
    %0 = vector.load %arg1[%c0, %c0_0] : memref<8x384xf32, #tpu.memory_space<vmem>>, vector<8x384xf32>
    %c0_1 = arith.constant 0 : index
    %c0_2 = arith.constant 0 : index
    %1 = vector.load %arg3[%c0_1, %c0_2] : memref<8x80xf32, #tpu.memory_space<vmem>>, vector<8x80xf32>
    %c0_3 = arith.constant 0 : index
    %c0_4 = arith.constant 0 : index
    %2 = vector.load %arg4[%c0_3, %c0_4] : memref<8x80xf32, #tpu.memory_space<vmem>>, vector<8x80xf32>
    %c0_5 = arith.constant 0 : index
    %c0_6 = arith.constant 0 : index
    %c0_7 = arith.constant 0 : index
    %3 = vector.load %arg2[%c0_5, %c0_6, %c0_7] : memref<1x8x384xf32, #tpu.memory_space<vmem>>, vector<1x8x384xf32>
    %4 = vector.shape_cast %3 : vector<1x8x384xf32> to vector<8x384xf32>
    %c19_i32 = arith.constant 19 : i32
    %5 = tpu.dynamic_rotate %4 by %c19_i32 dim 1 : vector<8x384xf32>, i32 -> vector<8x384xf32>
    %c18_i32 = arith.constant 18 : i32
    %6 = tpu.dynamic_rotate %4 by %c18_i32 dim 1 : vector<8x384xf32>, i32 -> vector<8x384xf32>
    %c17_i32 = arith.constant 17 : i32
    %7 = tpu.dynamic_rotate %4 by %c17_i32 dim 1 : vector<8x384xf32>, i32 -> vector<8x384xf32>
    %c1_i32 = arith.constant 1 : i32
    %8 = tpu.dynamic_rotate %4 by %c1_i32 dim 1 : vector<8x384xf32>, i32 -> vector<8x384xf32>
    %c383_i32 = arith.constant 383 : i32
    %9 = tpu.dynamic_rotate %4 by %c383_i32 dim 1 : vector<8x384xf32>, i32 -> vector<8x384xf32>
    %c367_i32 = arith.constant 367 : i32
    %10 = tpu.dynamic_rotate %4 by %c367_i32 dim 1 : vector<8x384xf32>, i32 -> vector<8x384xf32>
    %c366_i32 = arith.constant 366 : i32
    %11 = tpu.dynamic_rotate %4 by %c366_i32 dim 1 : vector<8x384xf32>, i32 -> vector<8x384xf32>
    %c365_i32 = arith.constant 365 : i32
    %12 = tpu.dynamic_rotate %4 by %c365_i32 dim 1 : vector<8x384xf32>, i32 -> vector<8x384xf32>
    %13 = tpu.concatenate %5, %6, %7, %8, %4, %9, %10, %11, %12, %0 in 0 : vector<8x384xf32>, vector<8x384xf32>, vector<8x384xf32>, vector<8x384xf32>, vector<8x384xf32>, vector<8x384xf32>, vector<8x384xf32>, vector<8x384xf32>, vector<8x384xf32>, vector<8x384xf32> -> vector<80x384xf32>
    %cst = arith.constant dense<0.000000e+00> : vector<8x384xf32>
    %14 = tpu.matmul %1, %13, %cst {dimension_numbers = #tpu.dot_dimension_numbers<[1], [0], [0], [1], [0, 0, 1, 1], [], []>} : vector<8x80xf32>, vector<80x384xf32>, vector<8x384xf32> -> vector<8x384xf32>
    %cst_8 = arith.constant 0.000000e+00 : f32
    %15 = vector.broadcast %cst_8 : f32 to vector<8x384xf32>
    %16 = arith.maximumf %14, %15 : vector<8x384xf32>
    %17 = arith.mulf %16, %0 : vector<8x384xf32>
    %c19_i32_9 = arith.constant 19 : i32
    %18 = tpu.dynamic_rotate %17 by %c19_i32_9 dim 1 : vector<8x384xf32>, i32 -> vector<8x384xf32>
    %c18_i32_10 = arith.constant 18 : i32
    %19 = tpu.dynamic_rotate %17 by %c18_i32_10 dim 1 : vector<8x384xf32>, i32 -> vector<8x384xf32>
    %c17_i32_11 = arith.constant 17 : i32
    %20 = tpu.dynamic_rotate %17 by %c17_i32_11 dim 1 : vector<8x384xf32>, i32 -> vector<8x384xf32>
    %c1_i32_12 = arith.constant 1 : i32
    %21 = tpu.dynamic_rotate %17 by %c1_i32_12 dim 1 : vector<8x384xf32>, i32 -> vector<8x384xf32>
    %c383_i32_13 = arith.constant 383 : i32
    %22 = tpu.dynamic_rotate %17 by %c383_i32_13 dim 1 : vector<8x384xf32>, i32 -> vector<8x384xf32>
    %c367_i32_14 = arith.constant 367 : i32
    %23 = tpu.dynamic_rotate %17 by %c367_i32_14 dim 1 : vector<8x384xf32>, i32 -> vector<8x384xf32>
    %c366_i32_15 = arith.constant 366 : i32
    %24 = tpu.dynamic_rotate %17 by %c366_i32_15 dim 1 : vector<8x384xf32>, i32 -> vector<8x384xf32>
    %c365_i32_16 = arith.constant 365 : i32
    %25 = tpu.dynamic_rotate %17 by %c365_i32_16 dim 1 : vector<8x384xf32>, i32 -> vector<8x384xf32>
    %26 = tpu.concatenate %18, %19, %20, %21, %17, %22, %23, %24, %25, %0 in 0 : vector<8x384xf32>, vector<8x384xf32>, vector<8x384xf32>, vector<8x384xf32>, vector<8x384xf32>, vector<8x384xf32>, vector<8x384xf32>, vector<8x384xf32>, vector<8x384xf32>, vector<8x384xf32> -> vector<80x384xf32>
    %cst_17 = arith.constant dense<0.000000e+00> : vector<8x384xf32>
    %27 = tpu.matmul %2, %26, %cst_17 {dimension_numbers = #tpu.dot_dimension_numbers<[1], [0], [0], [1], [0, 0, 1, 1], [], []>} : vector<8x80xf32>, vector<80x384xf32>, vector<8x384xf32> -> vector<8x384xf32>
    %28 = arith.addf %27, %4 : vector<8x384xf32>
    %c0_18 = arith.constant 0 : index
    %c0_19 = arith.constant 0 : index
    %c0_20 = arith.constant 0 : index
    %29 = vector.load %arg5[%c0_18, %c0_19, %c0_20] : memref<1x8x384xf32, #tpu.memory_space<vmem>>, vector<1x8x384xf32>
    %30 = vector.shape_cast %29 : vector<1x8x384xf32> to vector<8x384xf32>
    %31 = vector.shape_cast %28 : vector<8x384xf32> to vector<1x8x384xf32>
    tpu.vector_store %arg5[%c0_18, %c0_19, %c0_20], %31 {strides = array<i32>} : memref<1x8x384xf32, #tpu.memory_space<vmem>>, vector<1x8x384xf32>,
    return
  }
  func.func @transform_0(%arg0: i32) -> (i32, i32) {
    %c0_i32 = arith.constant 0 : i32
    %c0_i32_0 = arith.constant 0 : i32
    %c0_i32_1 = arith.constant 0 : i32
    return %c0_i32, %c0_i32_0 : i32, i32
  }
  func.func @transform_1(%arg0: i32) -> (i32, i32, i32) {
    %c0_i32 = arith.constant 0 : i32
    %c0_i32_0 = arith.constant 0 : i32
    %c0_i32_1 = arith.constant 0 : i32
    return %arg0, %c0_i32, %c0_i32_0 : i32, i32, i32
  }
  func.func @transform_2(%arg0: i32) -> (i32, i32) {
    %c0_i32 = arith.constant 0 : i32
    %c0_i32_0 = arith.constant 0 : i32
    %c0_i32_1 = arith.constant 0 : i32
    return %c0_i32, %c0_i32_0 : i32, i32
  }
  func.func @transform_3(%arg0: i32) -> (i32, i32) {
    %c0_i32 = arith.constant 0 : i32
    %c0_i32_0 = arith.constant 0 : i32
    %c0_i32_1 = arith.constant 0 : i32
    return %c0_i32, %c0_i32_0 : i32, i32
  }
  func.func @transform_4(%arg0: i32) -> (i32, i32, i32) {
    %c0_i32 = arith.constant 0 : i32
    %c0_i32_0 = arith.constant 0 : i32
    %c0_i32_1 = arith.constant 0 : i32
    return %arg0, %c0_i32, %c0_i32_0 : i32, i32, i32
  }
}

</mosaic_0001>

<bundles_post_ra>
// kernel: basic_block_pallas.1
= control target key start
LH: loop header
LB: loop body
LE: loop exit
PB: predicated region body
PF: predicated region fallthrough
CT: control target
= control target key end

     0   :  { %v714_v3 = vmov 0.0|0.0   ;;  %s715_s21 = smov 19   ;;  %s716_s22 = smov 18   ;;  %vm722_vm0 = vmmov 0   ;;  %v723_v6 = vmov 0.0   ;;  %v31_v7 = vlaneseq  ;;  %s1001_s1 = inlined_call_operand.vmem [shape: f32[1,8,384], index: 1, kind: input, shape index: {}]   ;;  %s1002_s0 = inlined_call_operand.vmem [shape: f32[8,384], index: 0, kind: input, shape index: {}]   ;;  %s1003_s2 = inlined_call_operand.vmem [shape: f32[8,80], index: 2, kind: input, shape index: {}]   ;;  %s1004_s3 = inlined_call_operand.vmem [shape: f32[8,80], index: 3, kind: input, shape index: {}]   ;;  %s1005_s4 = inlined_call_operand.vmem [shape: f32[1,8,384], index: 4, kind: output, shape index: {}]  }
   0x1   :  { %v753_v0 = vld [vmem:[%s1001_s1 + $0x10] sm:$0xff]  ;;  %v758_v1 = vld [vmem:[%s1001_s1] sm:$0xff]  ;;  %v763_v2 = vld [vmem:[%s1001_s1 + $0x8] sm:$0xff]  ;;  %573 = vmatprep.subr.bf16.mxu1 %v714_v3  ;;  %s717_s1 = smov 1   ;;  %s718_s23 = smov 17   ;;  %527 = vmatprep.mubr.msk.f32.mxu1 %vm722_vm0, %v723_v6  ;;  %vm107_vm9 = vcmask 654336  }
   0x2   :  { %29 = vrot.lane.b32.xlu1 %v753_v0, %s715_s21  ;;  %v634_v4 = vpack.i.bf16 %v763_v2, %v758_v1  ;;  %v654_v5 = vpack.i.bf16 %v753_v0, %v763_v2  ;;  %s719_s24 = smov 127   ;;  %s720_s25 = smov 110   ;;  %175 = vmatprep.mubr.f32.mxu0 %v723_v6  ;;  %v797_v9 = vand.u32 127, %v31_v7 }
   0x3   :  { %s721_s26 = smov 111   ;;  %s724_s27 = smov 109  }
   0x4   :  { %635 = vrot.lane.b32.xlu0 %v634_v4, %s715_s21  ;;  %vm33_vm1 = vcmp.lt.s32.totalorder %v797_v9, 19  ;;  %vm43_vm2 = vcmp.lt.s32.totalorder %v797_v9, 18  ;;  %vm63_vm3 = vcmp.lt.s32.totalorder %v797_v9, 1  ;;  %vm53_vm4 = vcmp.lt.s32.totalorder %v797_v9, 17 }
   0x5   :  { %vm73_vm5 = vcmp.lt.s32.totalorder %v797_v9, 127  ;;  %vm93_vm6 = vcmp.lt.s32.totalorder %v797_v9, 110  ;;  %vm83_vm7 = vcmp.lt.s32.totalorder %v797_v9, 111  ;;  %vm103_vm8 = vcmp.lt.s32.totalorder %v797_v9, 109 }
   0x6   :  { %41 = vrot.lane.b32.xlu1 %v753_v0, %s716_s22 }
   0x8   :  { %640 = vrot.lane.b32.xlu0 %v634_v4, %s716_s22 }
   0xa   :  { %650 = vrot.lane.b32.xlu1 %v634_v4, %s717_s1 }
   0xc   :  { %645 = vrot.lane.b32.xlu0 %v634_v4, %s718_s23 }
   0xe   :  { %61 = vrot.lane.b32.xlu1 %v753_v0, %s717_s1 }
  0x10   :  { %51 = vrot.lane.b32.xlu0 %v753_v0, %s718_s23 }
  0x12   :  { %67 = vrot.lane.b32.xlu1 %v758_v1, %s719_s24 }
  0x14   :  { %655 = vrot.lane.b32.xlu0 %v654_v5, %s719_s24 }
  0x16   :  { %665 = vrot.lane.b32.xlu1 %v654_v5, %s720_s25 }
  0x18   :  { %660 = vrot.lane.b32.xlu0 %v654_v5, %s721_s26 }
  0x1a   :  { %87 = vrot.lane.b32.xlu1 %v758_v1, %s720_s25 }
  0x1c   :  { %77 = vrot.lane.b32.xlu0 %v758_v1, %s721_s26 }
  0x1e   :  { %97 = vrot.lane.b32.xlu1 %v758_v1, %s724_s27 }
  0x20   :  { %670 = vrot.lane.b32.xlu0 %v654_v5, %s724_s27 }
  0x74   :  { %v30_v8 = vpop.permute.xlu1 %29 }
  0x76   :  { %v636_v10 = vpop.permute.xlu0 %635 }
  0x77   :  { %v638_v11 = vunpack.i.h.bf16 %v636_v10  ;;  %v637_v12 = vunpack.i.l.bf16 %v636_v10 }
  0x78   :  { %v42_v13 = vpop.permute.xlu1 %41 }
  0x79   :  { %v35_v18 = vsel %vm33_vm1, %v637_v12, %v638_v11  ;;  %v34_v19 = vsel %vm33_vm1, %v638_v11, %v30_v8  ;;  %v36_v27 = vsel %vm33_vm1, %v30_v8, %v637_v12 }
  0x7a   :  { %v641_v14 = vpop.permute.xlu0 %640 }
  0x7b   :  { %v643_v15 = vunpack.i.h.bf16 %v641_v14  ;;  %v642_v16 = vunpack.i.l.bf16 %v641_v14 }
  0x7c   :  { %v651_v17 = vpop.permute.xlu1 %650 }
  0x7d   :  { %v653_v20 = vunpack.i.h.bf16 %v651_v17  ;;  %v652_v21 = vunpack.i.l.bf16 %v651_v17  ;;  %v45_v22 = vsel %vm43_vm2, %v642_v16, %v643_v15  ;;  %v44_v23 = vsel %vm43_vm2, %v643_v15, %v42_v13  ;;  %v863_v17 = vld [vmem:[%s1002_s0 + $0x10] sm:$0xff] }
  0x7e   :  { %v646_v24 = vpop.permute.xlu0 %645  ;;  %v553_v25 = vpack.c.bf16 %v45_v22, %v35_v18  ;;  %v574_v26 = vpack.c.bf16 %v44_v23, %v34_v19  ;;  %v46_v28 = vsel %vm43_vm2, %v42_v13, %v642_v16  ;;  %v858_v16 = vld [vmem:[%s1002_s0] sm:$0xff]  ;;  %v869_v18 = vld [vmem:[%s1002_s0 + $0x8] sm:$0xff] }
  0x7f   :  { %v648_v29 = vunpack.i.h.bf16 %v646_v24  ;;  %v647_v30 = vunpack.i.l.bf16 %v646_v24  ;;  %v555_v31 = vpack.c.bf16 %v46_v28, %v36_v27  ;;  %v65_v32 = vsel %vm63_vm3, %v652_v21, %v653_v20 }
  0x80   :  { %554 = vmatprep.subr.bf16.mxu0 %v553_v25  ;;  %575 = vmatpush3.bf16.msra.mxu1 %v574_v26  ;;  %v62_v33 = vpop.permute.xlu1 %61  ;;  %v20_v25 = vld [vmem:[%s1003_s2] sm:$0xff] }
  0x81   :  { %556 = vmatpush1.bf16.msra.mxu0 %v555_v31  ;;  %v64_v34 = vsel %vm63_vm3, %v653_v20, %v62_v33  ;;  %v66_v35 = vsel %vm63_vm3, %v62_v33, %v652_v21  ;;  %v55_v36 = vsel %vm53_vm4, %v647_v30, %v648_v29  ;;  %576 = vmatprep.subr.bf16.mxu1 %v714_v3 }
  0x82   :  { %v52_v37 = vpop.permute.xlu0 %51  ;;  %v557_v38 = vpack.c.bf16 %v65_v32, %v55_v36 }
  0x83   :  { %v54_v39 = vsel %vm53_vm4, %v648_v29, %v52_v37  ;;  %v56_v40 = vsel %vm53_vm4, %v52_v37, %v647_v30 }
  0x84   :  { %v559_v41 = vpack.c.bf16 %v66_v35, %v56_v40  ;;  %v577_v42 = vpack.c.bf16 %v64_v34, %v54_v39  ;;  %558 = vmatprep.subr.bf16.mxu0 %v557_v38  ;;  %v68_v43 = vpop.permute.xlu1 %67 }
  0x86   :  { %v656_v44 = vpop.permute.xlu0 %655  ;;  %560 = vmatpush1.bf16.msra.mxu0 %v559_v41  ;;  %578 = vmatpush3.bf16.msra.mxu1 %v577_v42 }
  0x87   :  { %v658_v45 = vunpack.i.h.bf16 %v656_v44  ;;  %v657_v46 = vunpack.i.l.bf16 %v656_v44  ;;  %579 = vmatprep.subr.bf16.mxu1 %v714_v3 }
  0x88   :  { %v666_v47 = vpop.permute.xlu1 %665 }
  0x89   :  { %v668_v48 = vunpack.i.h.bf16 %v666_v47  ;;  %v667_v49 = vunpack.i.l.bf16 %v666_v47  ;;  %v74_v50 = vsel %vm73_vm5, %v657_v46, %v658_v45  ;;  %v76_v51 = vsel %vm73_vm5, %v658_v45, %v68_v43 }
  0x8a   :  { %v661_v52 = vpop.permute.xlu0 %660  ;;  %v561_v53 = vpack.c.bf16 %v74_v50, %v763_v2  ;;  %v580_v54 = vpack.c.bf16 %v76_v51, %v753_v0  ;;  %v75_v55 = vsel %vm73_vm5, %v68_v43, %v657_v46 }
  0x8b   :  { %v663_v56 = vunpack.i.h.bf16 %v661_v52  ;;  %v662_v57 = vunpack.i.l.bf16 %v661_v52  ;;  %v563_v58 = vpack.c.bf16 %v75_v55, %v758_v1  ;;  %v94_v59 = vsel %vm93_vm6, %v667_v49, %v668_v48 }
  0x8c   :  { %562 = vmatprep.subr.bf16.mxu0 %v561_v53  ;;  %581 = vmatpush3.bf16.msra.mxu1 %v580_v54  ;;  %v88_v60 = vpop.permute.xlu1 %87 }
  0x8d   :  { %564 = vmatpush1.bf16.msra.mxu0 %v563_v58  ;;  %v95_v61 = vsel %vm93_vm6, %v88_v60, %v667_v49  ;;  %v96_v62 = vsel %vm93_vm6, %v668_v48, %v88_v60  ;;  %v84_v63 = vsel %vm83_vm7, %v662_v57, %v663_v56  ;;  %582 = vmatprep.subr.bf16.mxu1 %v714_v3 }
  0x8e   :  { %v78_v4 = vpop.permute.xlu0 %77  ;;  %v565_v5 = vpack.c.bf16 %v94_v59, %v84_v63 }
  0x8f   :  { %v85_v7 = vsel %vm83_vm7, %v78_v4, %v662_v57  ;;  %v86_v8 = vsel %vm83_vm7, %v663_v56, %v78_v4 }
  0x90   :  { %v567_v10 = vpack.c.bf16 %v95_v61, %v85_v7  ;;  %v583_v11 = vpack.c.bf16 %v96_v62, %v86_v8  ;;  %566 = vmatprep.subr.bf16.mxu0 %v565_v5  ;;  %v98_v13 = vpop.permute.xlu1 %97 }
  0x92   :  { %v671_v12 = vpop.permute.xlu0 %670  ;;  %568 = vmatpush1.bf16.msra.mxu0 %v567_v10  ;;  %584 = vmatpush3.bf16.msra.mxu1 %v583_v11 }
  0x93   :  { %v673_v14 = vunpack.i.h.bf16 %v671_v12  ;;  %v672_v15 = vunpack.i.l.bf16 %v671_v12  ;;  %585 = vmatprep.subr.bf16.mxu1 %v714_v3 }
  0x95   :  { %v105_v19 = vsel %vm103_vm8, %v98_v13, %v672_v15  ;;  %v106_v20 = vsel %vm103_vm8, %v673_v14, %v98_v13  ;;  %v104_v21 = vsel %vm103_vm8, %v672_v15, %v673_v14 }
  0x96   :  { %v571_v22 = vpack.c.bf16 %v858_v16, %v105_v19  ;;  %v586_v23 = vpack.c.bf16 %v863_v17, %v106_v20  ;;  %v569_v24 = vpack.c.bf16 %v869_v18, %v104_v21 }
  0x98   :  { %570 = vmatprep.subr.bf16.mxu0 %v569_v24  ;;  %587 = vmatpush3.bf16.msra.mxu1 %v586_v23 }
  0x99   :  { %572 = vmatpush1.bf16.msra.mxu0 %v571_v22  ;;  %608 = vmatprep.subr.bf16.mxu1 %v714_v3 }
  0x9b   :  { %528 = vmatmul.mubr.msk.f32.vlgmr.msra.gmra.mrb[0].mxu1 %vm107_vm9, %v20_v25 }
  0x9c   :  { %481 = vmatmul.mubr.msk.f32.vlgmr.msra.gmra.mrb[0].mxu0 %vm107_vm9, %v20_v25  ;;  %550 = vmatprep.mubr.msk.f32.mxu1 %vm722_vm0, %v723_v6 }
  0x9d   :  { %397 = vmatprep.mubr.f32.mxu0 %v723_v6 }
 0x16e   :  { %v248_v26 = vpop.f32.mrb[0].mxu1 }
 0x16f   :  { %v254_v27 = vmax.f32 %v248_v26, 0.0  ;;  %v177_v28 = vpop.f32.mrb[0].mxu0  ;;  %v529_v29 = vpop.f32.mrb[1].mxu1 }
 0x170   :  { %v252_v30 = vmax.f32 %v177_v28, 0.0  ;;  %v179_v31 = vpop.f32.mrb[1].mxu0 }
 0x171   :  { %v890_v32 = vmul.f32 %v254_v27, %v863_v17  ;;  %v253_v33 = vmax.f32 %v179_v31, 0.0 }
 0x172   :  { %v893_v34 = vmul.f32 %v252_v30, %v858_v16 }
 0x173   :  { %271 = vrot.lane.b32.xlu1 %v890_v32, %s716_s22  ;;  %262 = vrot.lane.b32.xlu0 %v890_v32, %s715_s21  ;;  %v900_v6 = vmul.f32 %v253_v33, %v869_v18 }
 0x175   :  { %v679_v35 = vpack.i.bf16 %v900_v6, %v893_v34  ;;  %v704_v36 = vpack.i.bf16 %v890_v32, %v900_v6 }
 0x177   :  { %289 = vrot.lane.b32.xlu1 %v890_v32, %s717_s1  ;;  %280 = vrot.lane.b32.xlu0 %v890_v32, %s718_s23 }
 0x17b   :  { %680 = vrot.lane.b32.xlu1 %v679_v35, %s716_s22  ;;  %675 = vrot.lane.b32.xlu0 %v679_v35, %s715_s21 }
 0x17f   :  { %690 = vrot.lane.b32.xlu1 %v679_v35, %s717_s1  ;;  %685 = vrot.lane.b32.xlu0 %v679_v35, %s718_s23 }
 0x183   :  { %294 = vrot.lane.b32.xlu1 %v893_v34, %s719_s24  ;;  %303 = vrot.lane.b32.xlu0 %v893_v34, %s721_s26 }
 0x187   :  { %705 = vrot.lane.b32.xlu1 %v704_v36, %s720_s25  ;;  %695 = vrot.lane.b32.xlu0 %v704_v36, %s719_s24 }
 0x18b   :  { %312 = vrot.lane.b32.xlu1 %v893_v34, %s720_s25  ;;  %700 = vrot.lane.b32.xlu0 %v704_v36, %s721_s26 }
 0x18f   :  { %321 = vrot.lane.b32.xlu1 %v893_v34, %s724_s27  ;;  %710 = vrot.lane.b32.xlu0 %v704_v36, %s724_s27 }
 0x1e5   :  { %v272_v37 = vpop.permute.xlu1 %271  ;;  %v263_v38 = vpop.permute.xlu0 %262 }
 0x1e9   :  { %v290_v39 = vpop.permute.xlu1 %289  ;;  %v281_v40 = vpop.permute.xlu0 %280 }
 0x1ed   :  { %v681_v41 = vpop.permute.xlu1 %680  ;;  %v676_v42 = vpop.permute.xlu0 %675 }
 0x1ee   :  { %v683_v43 = vunpack.i.h.bf16 %v681_v41  ;;  %v682_v44 = vunpack.i.l.bf16 %v681_v41  ;;  %v678_v45 = vunpack.i.h.bf16 %v676_v42  ;;  %v677_v46 = vunpack.i.l.bf16 %v676_v42 }
 0x1f0   :  { %v273_v47 = vsel %vm43_vm2, %v683_v43, %v272_v37  ;;  %v275_v48 = vsel %vm43_vm2, %v272_v37, %v682_v44  ;;  %v264_v49 = vsel %vm33_vm1, %v678_v45, %v263_v38  ;;  %v266_v50 = vsel %vm33_vm1, %v263_v38, %v677_v46 }
 0x1f1   :  { %v609_v51 = vpack.c.bf16 %v273_v47, %v264_v49  ;;  %v590_v52 = vpack.c.bf16 %v275_v48, %v266_v50  ;;  %v691_v53 = vpop.permute.xlu1 %690  ;;  %v686_v54 = vpop.permute.xlu0 %685  ;;  %v265_v55 = vsel %vm33_vm1, %v677_v46, %v678_v45  ;;  %v274_v56 = vsel %vm43_vm2, %v682_v44, %v683_v43 }
 0x1f2   :  { %v693_v57 = vunpack.i.h.bf16 %v691_v53  ;;  %v692_v58 = vunpack.i.l.bf16 %v691_v53  ;;  %v688_v59 = vunpack.i.h.bf16 %v686_v54  ;;  %v687_v60 = vunpack.i.l.bf16 %v686_v54 }
 0x1f3   :  { %v588_v61 = vpack.c.bf16 %v274_v56, %v265_v55  ;;  %610 = vmatpush3.bf16.msra.mxu1 %v609_v51 }
 0x1f4   :  { %v291_v62 = vsel %vm63_vm3, %v693_v57, %v290_v39  ;;  %v293_v63 = vsel %vm63_vm3, %v290_v39, %v692_v58  ;;  %v282_v4 = vsel %vm53_vm4, %v688_v59, %v281_v40  ;;  %v284_v5 = vsel %vm53_vm4, %v281_v40, %v687_v60  ;;  %611 = vmatprep.subr.bf16.mxu1 %v714_v3 }
 0x1f5   :  { %v612_v7 = vpack.c.bf16 %v291_v62, %v282_v4  ;;  %589 = vmatprep.subr.bf16.mxu0 %v588_v61  ;;  %v295_v8 = vpop.permute.xlu1 %294  ;;  %v304_v10 = vpop.permute.xlu0 %303  ;;  %v283_v11 = vsel %vm53_vm4, %v687_v60, %v688_v59  ;;  %v292_v12 = vsel %vm63_vm3, %v692_v58, %v693_v57  ;;  %v594_v13 = vpack.c.bf16 %v293_v63, %v284_v5 }
 0x1f6   :  { %591 = vmatpush1.bf16.msra.mxu0 %v590_v52  ;;  %v592_v14 = vpack.c.bf16 %v292_v12, %v283_v11  ;;  %v21_v52 = vld [vmem:[%s1004_s3] sm:$0xff] }
 0x1f7   :  { %613 = vmatpush3.bf16.msra.mxu1 %v612_v7 }
 0x1f8   :  { %593 = vmatprep.subr.bf16.mxu0 %v592_v14  ;;  %614 = vmatprep.subr.bf16.mxu1 %v714_v3 }
 0x1f9   :  { %v706_v15 = vpop.permute.xlu1 %705  ;;  %v696_v19 = vpop.permute.xlu0 %695 }
 0x1fa   :  { %595 = vmatpush1.bf16.msra.mxu0 %v594_v13  ;;  %v698_v20 = vunpack.i.h.bf16 %v696_v19  ;;  %v697_v21 = vunpack.i.l.bf16 %v696_v19  ;;  %v708_v22 = vunpack.i.h.bf16 %v706_v15  ;;  %v707_v23 = vunpack.i.l.bf16 %v706_v15 }
 0x1fc   :  { %v302_v24 = vsel %vm73_vm5, %v698_v20, %v295_v8  ;;  %v301_v25 = vsel %vm73_vm5, %v295_v8, %v697_v21  ;;  %v300_v26 = vsel %vm73_vm5, %v697_v21, %v698_v20  ;;  %v318_v38 = vsel %vm93_vm6, %v707_v23, %v708_v22 }
 0x1fd   :  { %v615_v27 = vpack.c.bf16 %v302_v24, %v890_v32  ;;  %v598_v28 = vpack.c.bf16 %v301_v25, %v893_v34  ;;  %v313_v29 = vpop.permute.xlu1 %312  ;;  %v701_v30 = vpop.permute.xlu0 %700  ;;  %v596_v31 = vpack.c.bf16 %v300_v26, %v900_v6 }
 0x1fe   :  { %v703_v33 = vunpack.i.h.bf16 %v701_v30  ;;  %v702_v35 = vunpack.i.l.bf16 %v701_v30  ;;  %v319_v36 = vsel %vm93_vm6, %v313_v29, %v707_v23  ;;  %v320_v37 = vsel %vm93_vm6, %v708_v22, %v313_v29 }
 0x1ff   :  { %597 = vmatprep.subr.bf16.mxu0 %v596_v31  ;;  %616 = vmatpush3.bf16.msra.mxu1 %v615_v27 }
 0x200   :  { %v311_v32 = vsel %vm83_vm7, %v703_v33, %v304_v10  ;;  %v310_v34 = vsel %vm83_vm7, %v304_v10, %v702_v35  ;;  %599 = vmatpush1.bf16.msra.mxu0 %v598_v28  ;;  %617 = vmatprep.subr.bf16.mxu1 %v714_v3  ;;  %v309_v6 = vsel %vm83_vm7, %v702_v35, %v703_v33 }
 0x201   :  { %v618_v39 = vpack.c.bf16 %v320_v37, %v311_v32  ;;  %v602_v40 = vpack.c.bf16 %v319_v36, %v310_v34  ;;  %v711_v41 = vpop.permute.xlu0 %710  ;;  %v600_v42 = vpack.c.bf16 %v318_v38, %v309_v6  ;;  %v322_v45 = vpop.permute.xlu1 %321 }
 0x202   :  { %v713_v43 = vunpack.i.h.bf16 %v711_v41  ;;  %v712_v44 = vunpack.i.l.bf16 %v711_v41 }
 0x203   :  { %601 = vmatprep.subr.bf16.mxu0 %v600_v42  ;;  %619 = vmatpush3.bf16.msra.mxu1 %v618_v39 }
 0x204   :  { %v329_v46 = vsel %vm103_vm8, %v713_v43, %v322_v45  ;;  %v328_v47 = vsel %vm103_vm8, %v322_v45, %v712_v44  ;;  %603 = vmatpush1.bf16.msra.mxu0 %v602_v40  ;;  %620 = vmatprep.subr.bf16.mxu1 %v714_v3  ;;  %v327_v48 = vsel %vm103_vm8, %v712_v44, %v713_v43 }
 0x205   :  { %v621_v49 = vpack.c.bf16 %v863_v17, %v329_v46  ;;  %v606_v50 = vpack.c.bf16 %v858_v16, %v328_v47  ;;  %v604_v51 = vpack.c.bf16 %v869_v18, %v327_v48 }
 0x207   :  { %605 = vmatprep.subr.bf16.mxu0 %v604_v51  ;;  %622 = vmatpush3.bf16.msra.mxu1 %v621_v49 }
 0x208   :  { %607 = vmatpush1.bf16.msra.mxu0 %v606_v50 }
 0x20a   :  { %551 = vmatmul.mubr.msk.f32.vlgmr.msra.gmra.mrb[2].mxu1 %vm107_vm9, %v21_v52 }
 0x20b   :  { %483 = vmatmul.mubr.msk.f32.vlgmr.msra.gmra.mrb[2].mxu0 %vm107_vm9, %v21_v52 }
 0x2dd   :  { %v470_v3 = vpop.f32.mrb[2].mxu1 }
 0x2de   :  { %v399_v9 = vpop.f32.mrb[2].mxu0  ;;  %v471_v53 = vadd.f32 %v470_v3, %v753_v0  ;;  %v552_v17 = vpop.f32.mrb[3].mxu1 }
 0x2df   :  { %v400_v16 = vadd.f32 %v399_v9, %v758_v1  ;;  %v401_v54 = vpop.f32.mrb[3].mxu0 }
 0x2e0   :  { %476 = vst [vmem:[%s1005_s4 + $0x10] sm:$0xff] %v471_v53  ;;  %v402_v18 = vadd.f32 %v401_v54, %v763_v2 }
 0x2e1   :  { %474 = vst [vmem:[%s1005_s4] sm:$0xff] %v400_v16 }
 0x2e2   :  { %475 = vst [vmem:[%s1005_s4 + $0x8] sm:$0xff] %v402_v18 }

</bundles_post_ra>
